<compile_context>
chip_gen: v7x
topology: tpu7x:2x2x1
jax: 0.10.0
libtpu: 0.0.40
codegen_flags: <defaults>
</compile_context>

<pallas_src>
import functools

import jax
import jax.numpy as jnp
from jax.experimental import pallas as pl
from jax.experimental.pallas import tpu as pltpu

EPS_BN = 1e-5
EPS_LN = 1e-5
LANES = 128
VMEM_LIMIT = 48 * 1024 * 1024  # leaves headroom on v7x (64 MiB physical VMEM)


def _round_up(x, m):
    return (x + m - 1) // m * m


# ----------------------------- Pallas kernels ------------------------------


def _conv_mm_stats_kernel(p_ref, w_ref, y_ref, ps_ref, acc_ref):
    """Tiled bf16 matmul (im2col conv) + streaming per-channel sum / sumsq."""
    k = pl.program_id(1)

    @pl.when(k == 0)
    def _():
        acc_ref[...] = jnp.zeros_like(acc_ref)

    acc_ref[...] += jnp.dot(p_ref[...], w_ref[...],
                            preferred_element_type=jnp.float32)

    @pl.when(k == pl.num_programs(1) - 1)
    def _():
        acc = acc_ref[...]
        y_ref[...] = acc
        ps_ref[...] = jnp.concatenate(
            [jnp.sum(acc, axis=0, keepdims=True),
             jnp.sum(acc * acc, axis=0, keepdims=True)], axis=0)


def conv_matmul_stats(patches, w_mat, tm, tk):
    m_pad, k_pad = patches.shape
    n_m, n_k = m_pad // tm, k_pad // tk
    return pl.pallas_call(
        _conv_mm_stats_kernel,
        out_shape=(jax.ShapeDtypeStruct((m_pad, LANES), jnp.float32),
                   jax.ShapeDtypeStruct((n_m, 2, LANES), jnp.float32)),
        grid=(n_m, n_k),
        in_specs=[pl.BlockSpec((tm, tk), lambda i, k: (i, k)),
                  pl.BlockSpec((tk, LANES), lambda i, k: (k, 0))],
        out_specs=(pl.BlockSpec((tm, LANES), lambda i, k: (i, 0)),
                   pl.BlockSpec((None, 2, LANES), lambda i, k: (i, 0, 0))),
        scratch_shapes=[pltpu.VMEM((tm, LANES), jnp.float32)],
        compiler_params=pltpu.CompilerParams(
            dimension_semantics=("parallel", "arbitrary"),
            vmem_limit_bytes=VMEM_LIMIT),
    )(patches, w_mat)


def _scale_shift_htanh_kernel(y_ref, a_ref, b_ref, o_ref):
    # BatchNorm (precomputed global batch stats folded into scale/shift)
    # followed by Hardtanh(0, 20).
    o_ref[...] = jnp.clip(y_ref[...] * a_ref[...] + b_ref[...], 0.0, 20.0)


def scale_shift_htanh(y, scale, shift, tm):
    m_pad = y.shape[0]
    return pl.pallas_call(
        _scale_shift_htanh_kernel,
        out_shape=jax.ShapeDtypeStruct((m_pad, LANES), jnp.float32),
        grid=(m_pad // tm,),
        in_specs=[pl.BlockSpec((tm, LANES), lambda i: (i, 0)),
                  pl.BlockSpec((1, LANES), lambda i: (0, 0)),
                  pl.BlockSpec((1, LANES), lambda i: (0, 0))],
        out_specs=pl.BlockSpec((tm, LANES), lambda i: (i, 0)),
        compiler_params=pltpu.CompilerParams(
            dimension_semantics=("parallel",)),
    )(y, scale, shift)


def _colstats_kernel(x_ref, o_ref):
    """Streaming per-channel sum / sum-of-squares over the leading grid axis."""
    @pl.when(pl.program_id(0) == 0)
    def _():
        o_ref[...] = jnp.zeros_like(o_ref)

    x = x_ref[...]
    o_ref[...] += jnp.concatenate(
        [jnp.sum(x, axis=0, keepdims=True),
         jnp.sum(x * x, axis=0, keepdims=True)], axis=0)


def column_stats(x):
    """x: (L, N, D) f32 -> (2, D) = [column sum, column sum of squares]."""
    L, N, D = x.shape
    return pl.pallas_call(
        _colstats_kernel,
        out_shape=jax.ShapeDtypeStruct((2, D), jnp.float32),
        grid=(L,),
        in_specs=[pl.BlockSpec((None, N, D), lambda l: (l, 0, 0))],
        out_specs=pl.BlockSpec((2, D), lambda l: (0, 0)),
        compiler_params=pltpu.CompilerParams(
            dimension_semantics=("arbitrary",)),
    )(x)


def _gru_layer_kernel(x_ref, scale_ref, shift_ref, wih_ref, whh_ref,
                      bih_ref, bhh_ref, o_ref, h_ref):
    """Fused BatchNorm1d + ReLU + input projection + GRU step.

    Grid = (direction, L).  The hidden state lives in VMEM scratch and is
    reset at t == 0 for each direction.  Gate weights are per-gate matrices
    (no misaligned 3H lane slicing); MXU operands are bf16, state is f32.
    """
    t = pl.program_id(1)

    @pl.when(t == 0)
    def _():
        h_ref[...] = jnp.zeros_like(h_ref)

    xn = jnp.maximum(x_ref[...] * scale_ref[...] + shift_ref[...], 0.0)
    xn = xn.astype(jnp.bfloat16)                      # (N, D)

    h = h_ref[...]                                    # (N, H) f32
    hb = h.astype(jnp.bfloat16)

    def proj(g):
        gx = jnp.dot(xn, wih_ref[g], preferred_element_type=jnp.float32)
        hh = jnp.dot(hb, whh_ref[g], preferred_element_type=jnp.float32)
        return gx + bih_ref[g], hh + bhh_ref[g]

    gx_r, hh_r = proj(0)
    gx_z, hh_z = proj(1)
    gx_n, hh_n = proj(2)
    r = jax.nn.sigmoid(gx_r + hh_r)
    z = jax.nn.sigmoid(gx_z + hh_z)
    n = jnp.tanh(gx_n + r * hh_n)                     # b_hn stays inside r*(.)
    h_new = (1.0 - z) * n + z * h
    h_ref[...] = h_new
    o_ref[...] = h_new


def _ln_fc_kernel(x_ref, g_ref, b_ref, w_ref, o_ref, *, d_real):
    """LayerNorm over the real channels (padded lanes are zeros) + Linear."""
    x = x_ref[...]
    inv_d = 1.0 / d_real
    mean = jnp.sum(x, axis=-1, keepdims=True) * inv_d
    var = jnp.sum(x * x, axis=-1, keepdims=True) * inv_d - mean * mean
    var = jnp.maximum(var, 0.0)
    xn = (x - mean) * jax.lax.rsqrt(var + EPS_LN) * g_ref[...] + b_ref[...]
    o_ref[...] = jnp.dot(xn.astype(jnp.bfloat16), w_ref[...],
                         preferred_element_type=jnp.float32)


def ln_linear(x, gamma, beta, w_bf16, d_real):
    m, dp = x.shape
    tm = min(512, _round_up(m, 8))
    m_pad = _round_up(m, tm)
    if m_pad != m:
        x = jnp.pad(x, ((0, m_pad - m), (0, 0)))
    out = pl.pallas_call(
        functools.partial(_ln_fc_kernel, d_real=d_real),
        out_shape=jax.ShapeDtypeStruct((m_pad, LANES), jnp.float32),
        grid=(m_pad // tm,),
        in_specs=[pl.BlockSpec((tm, dp), lambda i: (i, 0)),
                  pl.BlockSpec((1, dp), lambda i: (0, 0)),
                  pl.BlockSpec((1, dp), lambda i: (0, 0)),
                  pl.BlockSpec((dp, LANES), lambda i: (0, 0))],
        out_specs=pl.BlockSpec((tm, LANES), lambda i: (i, 0)),
        compiler_params=pltpu.CompilerParams(
            dimension_semantics=("parallel",)),
    )(x, gamma[None, :], beta[None, :], w_bf16)
    return out[:m]


# ------------------------------- JAX glue ----------------------------------


def im2col_bf16(x, kh, kw, sh, sw, ph, pw, m_pad, k_pad):
    """x: (B, C, H, W) f32 -> zero-padded bf16 patches (m_pad, k_pad)."""
    B, C, H, W = x.shape
    Ho = (H + 2 * ph - kh) // sh + 1
    Wo = (W + 2 * pw - kw) // sw + 1
    xp = jnp.pad(x.astype(jnp.bfloat16), ((0, 0), (0, 0), (ph, ph), (pw, pw)))
    ih = (jnp.arange(Ho) * sh)[:, None] + jnp.arange(kh)[None, :]
    iw = (jnp.arange(Wo) * sw)[:, None] + jnp.arange(kw)[None, :]
    patches = xp[:, :, ih[:, :, None, None], iw[None, None, :, :]]
    patches = jnp.transpose(patches, (0, 2, 4, 1, 3, 5))   # (B,Ho,Wo,C,kh,kw)
    patches = patches.reshape(B * Ho * Wo, C * kh * kw)
    m, k = patches.shape
    return jnp.pad(patches, ((0, m_pad - m), (0, k_pad - k)))


def conv_bn_hardtanh_layer(x, w, gamma, beta, stride, padding):
    """Conv2d (+bias dropped: cancelled by train-mode BN) + BatchNorm2d +
    Hardtanh(0, 20).  x: (B, Cin, H, W) f32 -> (B, Cout, Ho, Wo) f32."""
    Cout, Cin, kh, kw = w.shape
    sh, sw = stride
    ph, pw = padding
    B, _, H, W = x.shape
    Ho = (H + 2 * ph - kh) // sh + 1
    Wo = (W + 2 * pw - kw) // sw + 1
    M = B * Ho * Wo
    K = Cin * kh * kw

    tm = min(512, _round_up(M, 8))
    tk = min(1024, _round_up(K, 128))
    m_pad = _round_up(M, tm)
    k_pad = _round_up(K, tk)

    patches = im2col_bf16(x, kh, kw, sh, sw, ph, pw, m_pad, k_pad)
    # weight: (Cout, K) -> (K, Cout) padded to 128 lanes (lane-dense MXU N).
    w_mat = jnp.zeros((k_pad, LANES), jnp.bfloat16)
    w_mat = w_mat.at[:K, :Cout].set(w.reshape(Cout, K).T.astype(jnp.bfloat16))

    y, pstats = conv_matmul_stats(patches, w_mat, tm, tk)

    # Global batch statistics from the per-tile partials (padded rows/channels
    # are exact zeros so they do not perturb sums; divide by the real M).
    s = jnp.sum(pstats, axis=0)                            # (2, 128)
    mean = s[0] / M
    var = jnp.maximum(s[1] / M - mean * mean, 0.0)
    gamma_p = jnp.zeros((LANES,), jnp.float32).at[:Cout].set(gamma)
    beta_p = jnp.zeros((LANES,), jnp.float32).at[:Cout].set(beta)
    scale = gamma_p * jax.lax.rsqrt(var + EPS_BN)
    shift = beta_p - mean * scale

    out = scale_shift_htanh(y, scale[None, :], shift[None, :], tm)
    out = out[:M, :Cout].reshape(B, Ho, Wo, Cout)
    return jnp.transpose(out, (0, 3, 1, 2))                # (B, Cout, Ho, Wo)


def gru_bn_layer(x, lp, hidden, h_pad):
    """One BNReluRNN layer.

    x: (L, N, D) f32 where L = real batch (the axis the batch_first GRU scans,
    reproducing the module's layout mismatch) and N = T' is the GRU batch.
    Returns (L, N, 2*h_pad); lanes [hidden:h_pad] and [h_pad+hidden:] are
    exact zeros (gate padding), so the next layer consumes it directly.
    """
    L, N, D = x.shape

    stats = column_stats(x)
    cnt = L * N
    mean = stats[0] / cnt
    var = jnp.maximum(stats[1] / cnt - mean * mean, 0.0)
    scale = lp["bn_gamma"] * jax.lax.rsqrt(var + EPS_BN)
    shift = lp["bn_beta"] - mean * scale

    def bidx(d, t):                       # fwd: t ; bwd: L-1-t (no [::-1] copies)
        return t + d * (L - 1 - 2 * t)

    return pl.pallas_call(
        _gru_layer_kernel,
        out_shape=jax.ShapeDtypeStruct((L, N, 2 * h_pad), jnp.float32),
        grid=(2, L),
        in_specs=[
            pl.BlockSpec((None, N, D), lambda d, t: (bidx(d, t), 0, 0)),
            pl.BlockSpec((1, D), lambda d, t: (0, 0)),
            pl.BlockSpec((1, D), lambda d, t: (0, 0)),
            pl.BlockSpec((None, 3, D, h_pad), lambda d, t: (d, 0, 0, 0)),
            pl.BlockSpec((None, 3, h_pad, h_pad), lambda d, t: (d, 0, 0, 0)),
            pl.BlockSpec((None, 3, 1, h_pad), lambda d, t: (d, 0, 0, 0)),
            pl.BlockSpec((None, 3, 1, h_pad), lambda d, t: (d, 0, 0, 0)),
        ],
        out_specs=pl.BlockSpec((None, N, h_pad),
                               lambda d, t: (bidx(d, t), 0, d)),
        scratch_shapes=[pltpu.VMEM((N, h_pad), jnp.float32)],
        compiler_params=pltpu.CompilerParams(
            dimension_semantics=("parallel", "arbitrary"),
            vmem_limit_bytes=VMEM_LIMIT),
    )(x, scale[None, :], shift[None, :],
      lp["w_ih"], lp["w_hh"], lp["b_ih"], lp["b_hh"])


def deepspeech2_forward(spectrogram, params):
    """spectrogram: (B, T, n_feats) -> logits (B, (T+1)//2, n_class)."""
    hidden = params["hidden"]
    n_class = params["n_class"]
    h_pad = _round_up(hidden, LANES)

    # inputs = spectrogram.unsqueeze(1).permute(0,1,3,2) -> (B, 1, n_feats, T)
    x = jnp.transpose(spectrogram, (0, 2, 1))[:, None, :, :]

    # MaskCNN (mask provably never fires with seq_length = inputs.size(-1))
    x = conv_bn_hardtanh_layer(x, params["conv1_w"], params["bn1_gamma"],
                               params["bn1_beta"], stride=(2, 2),
                               padding=(20, 5))
    x = conv_bn_hardtanh_layer(x, params["conv2_w"], params["bn2_gamma"],
                               params["bn2_beta"], stride=(2, 1),
                               padding=(10, 5))

    # (B, C, Fp, Tp) -> (L=B, N=Tp, D=C*Fp); this layout flows through every
    # RNN layer and absorbs the module's final permute(1, 0, 2) as well.
    B, C, Fp, Tp = x.shape
    out = jnp.transpose(x, (0, 3, 1, 2)).reshape(B, Tp, C * Fp)

    for lp in params["rnn_layers"]:
        out = gru_bn_layer(out, lp, hidden, h_pad)

    logits = ln_linear(out.reshape(B * Tp, 2 * h_pad),
                       params["ln_gamma"], params["ln_beta"],
                       params["fc_w"], d_real=2 * hidden)
    return logits[:, :n_class].reshape(B, Tp, n_class)


# --------------------------- parameter creation -----------------------------


def _expand_channels(v, hidden, h_pad):
    """(2*hidden,) -> (2*h_pad,), bwd half moved to offset h_pad, pads zero."""
    out = jnp.zeros((2 * h_pad,), v.dtype)
    out = out.at[:hidden].set(v[:hidden])
    out = out.at[h_pad:h_pad + hidden].set(v[hidden:])
    return out


def _pack_gru_direction(w_ih, w_hh, b_ih, b_hh, hidden, h_pad, d_exp):
    """PyTorch GRU tensors (one direction, gate order r|z|n) -> kernel layout:
    (3, d_exp, h_pad) bf16, (3, h_pad, h_pad) bf16, 2x (3, 1, h_pad) f32.
    Padded rows/cols are zero so padded hidden lanes stay exactly zero."""
    d_real = w_ih.shape[1]
    wt = jnp.transpose(w_ih.reshape(3, hidden, d_real), (0, 2, 1))
    wih_p = jnp.zeros((3, d_exp, h_pad), jnp.float32)
    if d_exp == d_real:
        wih_p = wih_p.at[:, :, :hidden].set(wt)
    else:  # input is a previous bidirectional layer: [fwd | pad | bwd | pad]
        wih_p = wih_p.at[:, :hidden, :hidden].set(wt[:, :hidden])
        wih_p = wih_p.at[:, h_pad:h_pad + hidden, :hidden].set(wt[:, hidden:])
    whh_p = jnp.zeros((3, h_pad, h_pad), jnp.float32)
    whh_p = whh_p.at[:, :hidden, :hidden].set(
        jnp.transpose(w_hh.reshape(3, hidden, hidden), (0, 2, 1)))
    bih_p = jnp.zeros((3, 1, h_pad), jnp.float32)
    bih_p = bih_p.at[:, 0, :hidden].set(b_ih.reshape(3, hidden))
    bhh_p = jnp.zeros((3, 1, h_pad), jnp.float32)
    bhh_p = bhh_p.at[:, 0, :hidden].set(b_hh.reshape(3, hidden))
    return (wih_p.astype(jnp.bfloat16), whh_p.astype(jnp.bfloat16),
            bih_p, bhh_p)


def init_params(key, n_feats, n_class, num_rnn_layers, hidden):
    keys = iter(jax.random.split(key, 256))

    def nrm(shape, scale=0.1):
        return scale * jax.random.normal(next(keys), shape, jnp.float32)

    h_pad = _round_up(hidden, LANES)
    p = {"hidden": hidden, "n_class": n_class}

    p["conv1_w"] = nrm((32, 1, 41, 11))
    p["bn1_gamma"] = 1.0 + nrm((32,))
    p["bn1_beta"] = nrm((32,))
    p["conv2_w"] = nrm((32, 32, 21, 11), 0.02)
    p["bn2_gamma"] = 1.0 + nrm((32,))
    p["bn2_beta"] = nrm((32,))
    # NOTE: Conv2d biases are omitted -- a per-channel constant shift is
    # exactly cancelled by the following train-mode BatchNorm2d.

    first_in = ((n_feats + 1) // 2 + 1) // 2 * 32
    layers = []
    for li in range(num_rnn_layers):
        d_real = first_in if li == 0 else 2 * hidden
        d_exp = first_in if li == 0 else 2 * h_pad
        bn_g = 1.0 + nrm((d_real,))
        bn_b = nrm((d_real,))
        if li == 0:
            lp = {"bn_gamma": bn_g, "bn_beta": bn_b}
        else:
            lp = {"bn_gamma": _expand_channels(bn_g, hidden, h_pad),
                  "bn_beta": _expand_channels(bn_b, hidden, h_pad)}
        wih, whh, bih, bhh = [], [], [], []
        for _d in range(2):                      # 0 = fwd, 1 = bwd
            a, b_, c, e = _pack_gru_direction(
                nrm((3 * hidden, d_real)), nrm((3 * hidden, hidden)),
                nrm((3 * hidden,)), nrm((3 * hidden,)),
                hidden, h_pad, d_exp)
            wih.append(a); whh.append(b_); bih.append(c); bhh.append(e)
        lp["w_ih"] = jnp.stack(wih)
        lp["w_hh"] = jnp.stack(whh)
        lp["b_ih"] = jnp.stack(bih)
        lp["b_hh"] = jnp.stack(bhh)
        layers.append(lp)
    p["rnn_layers"] = layers

    p["ln_gamma"] = _expand_channels(1.0 + nrm((2 * hidden,)), hidden, h_pad)
    p["ln_beta"] = _expand_channels(nrm((2 * hidden,)), hidden, h_pad)
    fc = nrm((n_class, 2 * hidden))
    fcw = jnp.zeros((2 * h_pad, LANES), jnp.float32)
    fcw = fcw.at[:hidden, :n_class].set(fc[:, :hidden].T)
    fcw = fcw.at[h_pad:h_pad + hidden, :n_class].set(fc[:, hidden:].T)
    p["fc_w"] = fcw.astype(jnp.bfloat16)
    return p


# ---------------------------------- main -------------------------------------

if __name__ == "__main__":
    B, T, n_feats = 2, 8, 16
    n_class, hidden, num_rnn_layers = 10, 32, 2

    key = jax.random.PRNGKey(0)
    k_x, k_p = jax.random.split(key)
    spectrogram = jax.random.normal(k_x, (B, T, n_feats), jnp.float32)
    params = init_params(k_p, n_feats, n_class, num_rnn_layers, hidden)

    out = deepspeech2_forward(spectrogram, params)
    out = jax.block_until_ready(out)
    assert out.shape == (B, (T + 1) // 2, n_class), out.shape
    assert bool(jnp.all(jnp.isfinite(out)))
    print("KERNEL_OK")
</pallas_src>

<mosaic_0001>
module attributes {stable_mosaic.version = 11 : i64} {
  func.func @_conv_mm_stats_kernel(%arg0: i32, %arg1: i32, %arg2: memref<64x512xbf16, #tpu.memory_space<vmem>>, %arg3: memref<512x128xbf16, #tpu.memory_space<vmem>>, %arg4: memref<64x128xf32, #tpu.memory_space<vmem>>, %arg5: memref<1x2x128xf32, #tpu.memory_space<vmem>>, %arg6: memref<64x128xf32, #tpu.memory_space<vmem>>) attributes {dimension_semantics = [#tpu.dimension_semantics<parallel>, #tpu.dimension_semantics<arbitrary>], iteration_bounds = array<i64: 1, 1>, scalar_prefetch = 0 : i64, scratch_operands = 1 : i64, tpu.core_type = #tpu.core_type<tc>, window_params = [{transform_indices = @transform_0, window_bounds = array<i64: 64, 512>}, {transform_indices = @transform_1, window_bounds = array<i64: 512, 128>}, {transform_indices = @transform_2, window_bounds = array<i64: 64, 128>}, {transform_indices = @transform_3, window_bounds = array<i64: 1, 2, 128>}]} {
    %c0_i32 = arith.constant 0 : i32
    %0 = arith.cmpi eq, %arg1, %c0_i32 : i32
    %1 = arith.extui %0 : i1 to i32
    %c0_i32_0 = arith.constant 0 : i32
    %2 = arith.cmpi ne, %1, %c0_i32_0 : i32
    scf.if %2 {
      %cst_10 = arith.constant 0.000000e+00 : f32
      %12 = vector.broadcast %cst_10 : f32 to vector<64x128xf32>
      %c0_11 = arith.constant 0 : index
      %c0_12 = arith.constant 0 : index
      %13 = vector.load %arg6[%c0_11, %c0_12] : memref<64x128xf32, #tpu.memory_space<vmem>>, vector<64x128xf32>
      tpu.vector_store %arg6[%c0_11, %c0_12], %12 {strides = array<i32>} : memref<64x128xf32, #tpu.memory_space<vmem>>, vector<64x128xf32>,
    } else {
    }
    %c0 = arith.constant 0 : index
    %c0_1 = arith.constant 0 : index
    %3 = vector.load %arg6[%c0, %c0_1] : memref<64x128xf32, #tpu.memory_space<vmem>>, vector<64x128xf32>
    %c0_2 = arith.constant 0 : index
    %c0_3 = arith.constant 0 : index
    %4 = vector.load %arg2[%c0_2, %c0_3] : memref<64x512xbf16, #tpu.memory_space<vmem>>, vector<64x512xbf16>
    %c0_4 = arith.constant 0 : index
    %c0_5 = arith.constant 0 : index
    %5 = vector.load %arg3[%c0_4, %c0_5] : memref<512x128xbf16, #tpu.memory_space<vmem>>, vector<512x128xbf16>
    %cst = arith.constant dense<0.000000e+00> : vector<64x128xf32>
    %6 = tpu.matmul %4, %5, %cst {dimension_numbers = #tpu.dot_dimension_numbers<[1], [0], [0], [1], [0, 0, 1, 1], [], []>} : vector<64x512xbf16>, vector<512x128xbf16>, vector<64x128xf32> -> vector<64x128xf32>
    %7 = arith.addf %3, %6 : vector<64x128xf32>
    %c0_6 = arith.constant 0 : index
    %c0_7 = arith.constant 0 : index
    %8 = vector.load %arg6[%c0_6, %c0_7] : memref<64x128xf32, #tpu.memory_space<vmem>>, vector<64x128xf32>
    tpu.vector_store %arg6[%c0_6, %c0_7], %7 {strides = array<i32>} : memref<64x128xf32, #tpu.memory_space<vmem>>, vector<64x128xf32>,
    %c0_i32_8 = arith.constant 0 : i32
    %9 = arith.cmpi eq, %arg1, %c0_i32_8 : i32
    %10 = arith.extui %9 : i1 to i32
    %c0_i32_9 = arith.constant 0 : i32
    %11 = arith.cmpi ne, %10, %c0_i32_9 : i32
    scf.if %11 {
      %c0_10 = arith.constant 0 : index
      %c0_11 = arith.constant 0 : index
      %12 = vector.load %arg6[%c0_10, %c0_11] : memref<64x128xf32, #tpu.memory_space<vmem>>, vector<64x128xf32>
      %c0_12 = arith.constant 0 : index
      %c0_13 = arith.constant 0 : index
      %13 = vector.load %arg4[%c0_12, %c0_13] : memref<64x128xf32, #tpu.memory_space<vmem>>, vector<64x128xf32>
      tpu.vector_store %arg4[%c0_12, %c0_13], %12 {strides = array<i32>} : memref<64x128xf32, #tpu.memory_space<vmem>>, vector<64x128xf32>,
      %cst_14 = arith.constant dense<0.000000e+00> : vector<128xf32>
      %14 = vector.multi_reduction <add>, %12, %cst_14 [0] : vector<64x128xf32> to vector<128xf32>
      %15 = vector.shape_cast %14 : vector<128xf32> to vector<1x128xf32>
      %16 = arith.mulf %12, %12 : vector<64x128xf32>
      %cst_15 = arith.constant dense<0.000000e+00> : vector<128xf32>
      %17 = vector.multi_reduction <add>, %16, %cst_15 [0] : vector<64x128xf32> to vector<128xf32>
      %18 = vector.shape_cast %17 : vector<128xf32> to vector<1x128xf32>
      %19 = tpu.concatenate %15, %18 in 0 : vector<1x128xf32>, vector<1x128xf32> -> vector<2x128xf32>
      %c0_16 = arith.constant 0 : index
      %c0_17 = arith.constant 0 : index
      %c0_18 = arith.constant 0 : index
      %20 = vector.load %arg5[%c0_16, %c0_17, %c0_18] : memref<1x2x128xf32, #tpu.memory_space<vmem>>, vector<1x2x128xf32>
      %21 = vector.shape_cast %20 : vector<1x2x128xf32> to vector<2x128xf32>
      %22 = vector.shape_cast %19 : vector<2x128xf32> to vector<1x2x128xf32>
      tpu.vector_store %arg5[%c0_16, %c0_17, %c0_18], %22 {strides = array<i32>} : memref<1x2x128xf32, #tpu.memory_space<vmem>>, vector<1x2x128xf32>,
    } else {
    }
    return
  }
  func.func @transform_0(%arg0: i32, %arg1: i32) -> (i32, i32) {
    %c0_i32 = arith.constant 0 : i32
    return %arg0, %arg1 : i32, i32
  }
  func.func @transform_1(%arg0: i32, %arg1: i32) -> (i32, i32) {
    %c0_i32 = arith.constant 0 : i32
    %c0_i32_0 = arith.constant 0 : i32
    return %arg1, %c0_i32 : i32, i32
  }
  func.func @transform_2(%arg0: i32, %arg1: i32) -> (i32, i32) {
    %c0_i32 = arith.constant 0 : i32
    %c0_i32_0 = arith.constant 0 : i32
    return %arg0, %c0_i32 : i32, i32
  }
  func.func @transform_3(%arg0: i32, %arg1: i32) -> (i32, i32, i32) {
    %c0_i32 = arith.constant 0 : i32
    %c0_i32_0 = arith.constant 0 : i32
    %c0_i32_1 = arith.constant 0 : i32
    return %arg0, %c0_i32, %c0_i32_0 : i32, i32, i32
  }
}

</mosaic_0001>

<bundles_post_ra>
// kernel: tpu_custom_call.1
= control target key start
LH: loop header
LB: loop body
LE: loop exit
PB: predicated region body
PF: predicated region fallthrough
CT: control target
= control target key end

     0   :  { %9 = vsyncpa [#allocation4], 0  ;;  %s1018_s0 = inlined_call_operand.hbm [shape: bf16[64,512], index: 0, kind: input, shape index: {}]   ;;  %s1019_s1 = inlined_call_operand.hbm [shape: bf16[512,128], index: 1, kind: input, shape index: {}]   ;;  %s1020_s2 = inlined_call_operand.hbm [shape: f32[64,128], index: 2, kind: output, shape index: {0}]   ;;  %s1021_s3 = inlined_call_operand.hbm [shape: f32[1,2,128], index: 3, kind: output, shape index: {1}]  }
   0x1   :  { %10 = vsyncpa [#allocation7], 0 }
   0x2   :  { %11 = vsyncpa [#allocation5], 0 }
   0x3   :  { %12 = vsyncpa [#allocation10], 0  ;;  %s940_s12 = smov [#allocation3]   ;;  %s844_s16 = scalar_lea.hbm %s1018_s0, 2048 }
   0x4   :  { %s18_s13 = sshll.u32 %s940_s12, 4  ;;  %p845_p0 = scmp.ne.s32.totalorder %s1018_s0, %s844_s16  ;;  %s19_s13 = int_to_ptr.vmem [resolvable:$true] %s18_s13 }
   0x5   :  { %p848_p1 = scmp.lt.u32.totalorder %s844_s16, %s1018_s0 }
   0x7   :  { %p850_p2 = pnand %p848_p1, %p845_p0 }
   0x9   :  { %853 = shalt.err (!%p850_p2)
}
   0xa   :  { %s854_s21 = scalar_lea.vmem %s19_s13, 2048  ;;  %p859_p4 = scmp.lt.s32.totalorder %s19_s13, %s19_s13 }
   0xb   :  { %p855_p3 = scmp.ne.s32.totalorder %s19_s13, %s854_s21  ;;  %p860_p5 = scmp.lt.s32.totalorder %s854_s21, %s854_s21 }
   0xd   :  { %p861_p6 = por %p860_p5, %p859_p4 }
   0xf   :  { %p862_p7 = pnand %p861_p6, %p855_p3 }
  0x11   :  { %865 = shalt.err (!%p862_p7)
}
  0x12   :  { %s941_s22 = smov 256   ;;  %s942_s23 = smov 16  }
  0x13   :  { %24 = dma.hbm_to_vmem [thread:$0]  %s1018_s0, 2048, %s19_s13, [#allocation4], %s941_s22, %s941_s22, %s942_s23  }
  0x14   :  { %s943_s26 = smov [#allocation6]   ;;  %s866_s30 = scalar_lea.hbm %s1019_s1, 4096 }
  0x15   :  { %s30_s27 = sshll.u32 %s943_s26, 4  ;;  %p867_p8 = scmp.ne.s32.totalorder %s1019_s1, %s866_s30  ;;  %s31_s27 = int_to_ptr.vmem [resolvable:$true] %s30_s27 }
  0x16   :  { %p870_p9 = scmp.lt.u32.totalorder %s866_s30, %s1019_s1 }
  0x18   :  { %p872_p10 = pnand %p870_p9, %p867_p8 }
  0x1a   :  { %875 = shalt.err (!%p872_p10)
}
  0x1b   :  { %s876_s8 = scalar_lea.vmem %s31_s27, 4096  ;;  %p881_p12 = scmp.lt.s32.totalorder %s31_s27, %s31_s27 }
  0x1c   :  { %p877_p11 = scmp.ne.s32.totalorder %s31_s27, %s876_s8  ;;  %p882_p13 = scmp.lt.s32.totalorder %s876_s8, %s876_s8 }
  0x1e   :  { %p883_p0 = por %p882_p13, %p881_p12 }
  0x20   :  { %p884_p1 = pnand %p883_p0, %p877_p11 }
  0x22   :  { %887 = shalt.err (!%p884_p1)
}
  0x23   :  { %s944_s0 = smov 64   ;;  %s945_s9 = smov 4  }
  0x24   :  { %36 = dma.hbm_to_vmem [thread:$0]  %s1019_s1, 4096, %s31_s27, [#allocation7], %s944_s0, %s944_s0, %s945_s9  }
  0x25   :  { %932 = dma.done.wait [#allocation4], 2048  }
  0x26   :  { %933 = vsyncadd [#allocation4], 4294965248 }
  0x27   :  { %934 = dma.done.wait [#allocation7], 4096  }
  0x28   :  { %935 = vsyncadd [#allocation7], 4294963200  ;;  %v788_v0 = vld [vmem:[#allocation6 + $0x40] sm:$0xff]   ;;  %v792_v4 = vld [vmem:[#allocation6 + $0x48] sm:$0xff]   ;;  %s946_s1 = smov [#allocation8]  }
  0x29   :  { %v789_v1 = vld [vmem:[#allocation6 + $0xc0] sm:$0xff]   ;;  %698 = vmatprep.subr.bf16.mxu0 %v788_v0  ;;  %v793_v5 = vld [vmem:[#allocation6 + $0xc8] sm:$0xff]   ;;  %v796_v8 = vld [vmem:[#allocation6 + $0x50] sm:$0xff]   ;;  %s623_s12 = sshll.u32 %s946_s1, 4  ;;  %s624_s12 = int_to_ptr.vmem [resolvable:$true] %s623_s12 }
  0x2a   :  { %v790_v2 = vld [vmem:[#allocation6] sm:$0xff]   ;;  %738 = vmatprep.subr.bf16.mxu1 %v789_v1  ;;  %v794_v6 = vld [vmem:[#allocation6 + $0x8] sm:$0xff]   ;;  %v797_v9 = vld [vmem:[#allocation6 + $0xd0] sm:$0xff]   ;;  %s888_s13 = scalar_lea.vmem %s624_s12, 1024  ;;  %p893_p3 = scmp.lt.s32.totalorder %s624_s12, %s624_s12 }
  0x2b   :  { %v791_v3 = vld [vmem:[#allocation6 + $0x80] sm:$0xff]   ;;  %699 = vmatpush3.bf16.msra.mxu0 %v790_v2  ;;  %v795_v7 = vld [vmem:[#allocation6 + $0x88] sm:$0xff]   ;;  %v798_v10 = vld [vmem:[#allocation6 + $0x10] sm:$0xff]   ;;  %p889_p2 = scmp.ne.s32.totalorder %s624_s12, %s888_s13  ;;  %p894_p4 = scmp.lt.s32.totalorder %s888_s13, %s888_s13 }
  0x2c   :  { %739 = vmatpush3.bf16.msra.mxu1 %v791_v3  ;;  %700 = vmatprep.subr.bf16.mxu0 %v792_v4  ;;  %v799_v11 = vld [vmem:[#allocation6 + $0x90] sm:$0xff]   ;;  %v800_v12 = vld [vmem:[#allocation6 + $0x58] sm:$0xff]   ;;  %v804_v16 = vld [vmem:[#allocation6 + $0x60] sm:$0xff]  }
  0x2d   :  { %740 = vmatprep.subr.bf16.mxu1 %v793_v5  ;;  %v801_v13 = vld [vmem:[#allocation6 + $0xd8] sm:$0xff]   ;;  %v805_v17 = vld [vmem:[#allocation6 + $0xe0] sm:$0xff]   ;;  %v808_v20 = vld [vmem:[#allocation6 + $0x68] sm:$0xff]   ;;  %p895_p5 = por %p894_p4, %p893_p3 }
  0x2e   :  { %v802_v14 = vld [vmem:[#allocation6 + $0x18] sm:$0xff]   ;;  %v806_v18 = vld [vmem:[#allocation6 + $0x20] sm:$0xff]   ;;  %v809_v21 = vld [vmem:[#allocation6 + $0xe8] sm:$0xff]  }
  0x2f   :  { %701 = vmatpush3.bf16.msra.mxu0 %v794_v6  ;;  %v803_v15 = vld [vmem:[#allocation6 + $0x98] sm:$0xff]   ;;  %v807_v19 = vld [vmem:[#allocation6 + $0xa0] sm:$0xff]   ;;  %v810_v22 = vld [vmem:[#allocation6 + $0x28] sm:$0xff]   ;;  %p896_p6 = pnand %p895_p5, %p889_p2 }
  0x30   :  { %741 = vmatpush3.bf16.msra.mxu1 %v795_v7  ;;  %702 = vmatprep.subr.bf16.mxu0 %v796_v8  ;;  %v811_v23 = vld [vmem:[#allocation6 + $0xa8] sm:$0xff]   ;;  %v812_v24 = vld [vmem:[#allocation6 + $0x70] sm:$0xff]   ;;  %v816_v28 = vld [vmem:[#allocation6 + $0x78] sm:$0xff]  }
  0x31   :  { %742 = vmatprep.subr.bf16.mxu1 %v797_v9  ;;  %v813_v25 = vld [vmem:[#allocation6 + $0xf0] sm:$0xff]   ;;  %v817_v29 = vld [vmem:[#allocation6 + $0xf8] sm:$0xff]  }
  0x32   :  { %v814_v26 = vld [vmem:[#allocation6 + $0x30] sm:$0xff]   ;;  %v818_v30 = vld [vmem:[#allocation6 + $0x38] sm:$0xff]  }
  0x33   :  { %703 = vmatpush3.bf16.msra.mxu0 %v798_v10  ;;  %v815_v27 = vld [vmem:[#allocation6 + $0xb0] sm:$0xff]   ;;  %v819_v31 = vld [vmem:[#allocation6 + $0xb8] sm:$0xff]  }
  0x34   :  { %743 = vmatpush3.bf16.msra.mxu1 %v799_v11  ;;  %704 = vmatprep.subr.bf16.mxu0 %v800_v12  ;;  %v820_v32 = vld [vmem:[#allocation3] ss:$16 sps:$4 sm:$0xff]   ;;  %v822_v33 = vld [vmem:[#allocation3 + $0x4] ss:$16 sps:$4 sm:$0xff]   ;;  %v823_v34 = vld [vmem:[#allocation3 + $0x8] ss:$16 sps:$4 sm:$0xff]  }
  0x35   :  { %744 = vmatprep.subr.bf16.mxu1 %v801_v13  ;;  %v825_v35 = vld [vmem:[#allocation3 + $0xc] ss:$16 sps:$4 sm:$0xff]   ;;  %448 = vmatprep.mubr.bf16.mxu0 %v822_v33  ;;  %v826_v36 = vld [vmem:[#allocation3 + $0x24] ss:$16 sps:$4 sm:$0xff]   ;;  %v830_v38 = vld [vmem:[#allocation3 + $0x20] ss:$16 sps:$4 sm:$0xff]  }
  0x36   :  { %513 = vmatprep.mubr.bf16.mxu1 %v825_v35  ;;  %v828_v37 = vld [vmem:[#allocation3 + $0x2c] ss:$16 sps:$4 sm:$0xff]   ;;  %v831_v39 = vld [vmem:[#allocation3 + $0x28] ss:$16 sps:$4 sm:$0xff]   ;;  %v832_v40 = vld [vmem:[#allocation3 + $0x44] ss:$16 sps:$4 sm:$0xff]  }
  0x37   :  { %705 = vmatpush3.bf16.msra.mxu0 %v802_v14  ;;  %v834_v41 = vld [vmem:[#allocation3 + $0x4c] ss:$16 sps:$4 sm:$0xff]   ;;  %v836_v42 = vld [vmem:[#allocation3 + $0x40] ss:$16 sps:$4 sm:$0xff]   ;;  %v837_v43 = vld [vmem:[#allocation3 + $0x48] ss:$16 sps:$4 sm:$0xff]  }
  0x38   :  { %745 = vmatpush3.bf16.msra.mxu1 %v803_v15  ;;  %706 = vmatprep.subr.bf16.mxu0 %v804_v16  ;;  %v838_v44 = vld [vmem:[#allocation3 + $0x64] ss:$16 sps:$4 sm:$0xff]   ;;  %v840_v45 = vld [vmem:[#allocation3 + $0x6c] ss:$16 sps:$4 sm:$0xff]   ;;  %v842_v46 = vld [vmem:[#allocation3 + $0x60] ss:$16 sps:$4 sm:$0xff]  }
  0x39   :  { %746 = vmatprep.subr.bf16.mxu1 %v805_v17  ;;  %v843_v47 = vld [vmem:[#allocation3 + $0x68] ss:$16 sps:$4 sm:$0xff]  }
  0x3b   :  { %707 = vmatpush3.bf16.msra.mxu0 %v806_v18 }
  0x3c   :  { %747 = vmatpush3.bf16.msra.mxu1 %v807_v19  ;;  %708 = vmatprep.subr.bf16.mxu0 %v808_v20 }
  0x3d   :  { %748 = vmatprep.subr.bf16.mxu1 %v809_v21 }
  0x3f   :  { %709 = vmatpush3.bf16.msra.mxu0 %v810_v22 }
  0x40   :  { %749 = vmatpush3.bf16.msra.mxu1 %v811_v23  ;;  %710 = vmatprep.subr.bf16.mxu0 %v812_v24 }
  0x41   :  { %750 = vmatprep.subr.bf16.mxu1 %v813_v25 }
  0x43   :  { %711 = vmatpush3.bf16.msra.mxu0 %v814_v26 }
  0x44   :  { %751 = vmatpush3.bf16.msra.mxu1 %v815_v27  ;;  %712 = vmatprep.subr.bf16.mxu0 %v816_v28 }
  0x45   :  { %752 = vmatprep.subr.bf16.mxu1 %v817_v29 }
  0x47   :  { %713 = vmatpush3.bf16.msra.mxu0 %v818_v30 }
  0x48   :  { %753 = vmatpush3.bf16.msra.mxu1 %v819_v31 }
  0x4a   :  { %449 = vmatmul.mubr.bf16.vlgmr.msra.gmra.mrb[0].mxu0 %v820_v32 }
  0x4b   :  { %514 = vmatmul.mubr.bf16.vlgmr.msra.gmra.mrb[0].mxu1 %v823_v34  ;;  %456 = vmatprep.mubr.bf16.mxu0 %v826_v36 }
  0x4c   :  { %521 = vmatprep.mubr.bf16.mxu1 %v828_v37 }
  0x52   :  { %457 = vmatmul.mubr.bf16.gmra.mrb[4].mxu0 %v830_v38 }
  0x53   :  { %522 = vmatmul.mubr.bf16.gmra.mrb[4].mxu1 %v831_v39  ;;  %464 = vmatprep.mubr.bf16.mxu0 %v832_v40 }
  0x54   :  { %529 = vmatprep.mubr.bf16.mxu1 %v834_v41 }
  0x5a   :  { %465 = vmatmul.mubr.bf16.gmra.mrb[8].mxu0 %v836_v42 }
  0x5b   :  { %530 = vmatmul.mubr.bf16.gmra.mrb[8].mxu1 %v837_v43  ;;  %472 = vmatprep.mubr.bf16.mxu0 %v838_v44 }
  0x5c   :  { %537 = vmatprep.mubr.bf16.mxu1 %v840_v45 }
  0x62   :  { %473 = vmatmul.mubr.bf16.gmra.mrb[12].mxu0 %v842_v46 }
  0x63   :  { %538 = vmatmul.mubr.bf16.gmra.mrb[12].mxu1 %v843_v47 }
 0x11d   :  { %v714_v48 = vpop.f32.mrb[0].mxu0 }
 0x11e   :  { %v754_v49 = vpop.f32.mrb[0].mxu1  ;;  %v715_v50 = vpop.f32.mrb[1].mxu0 }
 0x11f   :  { %v716_v51 = vadd.f32 %v715_v50, %v714_v48  ;;  %v755_v52 = vpop.f32.mrb[1].mxu1  ;;  %v717_v53 = vpop.f32.mrb[2].mxu0 }
 0x120   :  { %v756_v54 = vadd.f32 %v755_v52, %v754_v49  ;;  %v757_v55 = vpop.f32.mrb[2].mxu1  ;;  %v718_v56 = vpop.f32.mrb[3].mxu0 }
 0x121   :  { %v719_v57 = vadd.f32 %v718_v56, %v717_v53  ;;  %v758_v58 = vpop.f32.mrb[3].mxu1 }
 0x122   :  { %v516_v59 = vadd.f32 %v756_v54, %v716_v51  ;;  %v759_v60 = vadd.f32 %v758_v58, %v757_v55 }
 0x124   :  { %573 = vst [vmem:[#allocation8] sm:$0xff] %v516_v59  ;;  %v519_v61 = vadd.f32 %v759_v60, %v719_v57  ;;  %v594_v63 = vmul.f32 %v516_v59, %v516_v59 }
 0x125   :  { %v720_v62 = vpop.f32.mrb[4].mxu0 }
 0x126   :  { %574 = vst [vmem:[#allocation8 + $0x8] sm:$0xff] %v519_v61  ;;  %v581_v0 = vadd.f32 %v519_v61, %v516_v59  ;;  %v595_v1 = vmul.f32 %v519_v61, %v519_v61  ;;  %v760_v2 = vpop.f32.mrb[4].mxu1  ;;  %v721_v3 = vpop.f32.mrb[5].mxu0 }
 0x127   :  { %v722_v4 = vadd.f32 %v721_v3, %v720_v62  ;;  %v761_v5 = vpop.f32.mrb[5].mxu1  ;;  %v723_v6 = vpop.f32.mrb[6].mxu0 }
 0x128   :  { %v602_v7 = vadd.f32 %v595_v1, %v594_v63  ;;  %v762_v8 = vadd.f32 %v761_v5, %v760_v2  ;;  %v763_v9 = vpop.f32.mrb[6].mxu1  ;;  %v724_v10 = vpop.f32.mrb[7].mxu0 }
 0x129   :  { %v725_v11 = vadd.f32 %v724_v10, %v723_v6  ;;  %v764_v12 = vpop.f32.mrb[7].mxu1 }
 0x12a   :  { %v524_v13 = vadd.f32 %v762_v8, %v722_v4  ;;  %v765_v14 = vadd.f32 %v764_v12, %v763_v9 }
 0x12c   :  { %575 = vst [vmem:[#allocation8 + $0x10] sm:$0xff] %v524_v13  ;;  %v582_v15 = vadd.f32 %v581_v0, %v524_v13  ;;  %v596_v16 = vmul.f32 %v524_v13, %v524_v13  ;;  %v527_v17 = vadd.f32 %v765_v14, %v725_v11 }
 0x12d   :  { %v726_v18 = vpop.f32.mrb[8].mxu0 }
 0x12e   :  { %v603_v19 = vadd.f32 %v602_v7, %v596_v16  ;;  %576 = vst [vmem:[#allocation8 + $0x18] sm:$0xff] %v527_v17  ;;  %v583_v20 = vadd.f32 %v582_v15, %v527_v17  ;;  %v597_v21 = vmul.f32 %v527_v17, %v527_v17  ;;  %v766_v22 = vpop.f32.mrb[8].mxu1  ;;  %v727_v23 = vpop.f32.mrb[9].mxu0 }
 0x12f   :  { %v728_v24 = vadd.f32 %v727_v23, %v726_v18  ;;  %v767_v25 = vpop.f32.mrb[9].mxu1  ;;  %v729_v26 = vpop.f32.mrb[10].mxu0 }
 0x130   :  { %v604_v27 = vadd.f32 %v603_v19, %v597_v21  ;;  %v768_v28 = vadd.f32 %v767_v25, %v766_v22  ;;  %v769_v29 = vpop.f32.mrb[10].mxu1  ;;  %v730_v30 = vpop.f32.mrb[11].mxu0 }
 0x131   :  { %v731_v31 = vadd.f32 %v730_v30, %v729_v26  ;;  %v770_v32 = vpop.f32.mrb[11].mxu1 }
 0x132   :  { %v532_v33 = vadd.f32 %v768_v28, %v728_v24  ;;  %v771_v34 = vadd.f32 %v770_v32, %v769_v29 }
 0x134   :  { %577 = vst [vmem:[#allocation8 + $0x20] sm:$0xff] %v532_v33  ;;  %v584_v35 = vadd.f32 %v583_v20, %v532_v33  ;;  %v598_v36 = vmul.f32 %v532_v33, %v532_v33  ;;  %v535_v37 = vadd.f32 %v771_v34, %v731_v31 }
 0x135   :  { %v732_v38 = vpop.f32.mrb[12].mxu0 }
 0x136   :  { %v605_v39 = vadd.f32 %v604_v27, %v598_v36  ;;  %578 = vst [vmem:[#allocation8 + $0x28] sm:$0xff] %v535_v37  ;;  %v585_v40 = vadd.f32 %v584_v35, %v535_v37  ;;  %v599_v41 = vmul.f32 %v535_v37, %v535_v37  ;;  %v772_v42 = vpop.f32.mrb[12].mxu1  ;;  %v733_v43 = vpop.f32.mrb[13].mxu0 }
 0x137   :  { %v734_v44 = vadd.f32 %v733_v43, %v732_v38  ;;  %v773_v45 = vpop.f32.mrb[13].mxu1  ;;  %v735_v46 = vpop.f32.mrb[14].mxu0 }
 0x138   :  { %v606_v47 = vadd.f32 %v605_v39, %v599_v41  ;;  %v774_v48 = vadd.f32 %v773_v45, %v772_v42  ;;  %v775_v49 = vpop.f32.mrb[14].mxu1  ;;  %v736_v50 = vpop.f32.mrb[15].mxu0 }
 0x139   :  { %v737_v51 = vadd.f32 %v736_v50, %v735_v46  ;;  %v776_v52 = vpop.f32.mrb[15].mxu1 }
 0x13a   :  { %v540_v53 = vadd.f32 %v774_v48, %v734_v44  ;;  %v777_v54 = vadd.f32 %v776_v52, %v775_v49 }
 0x13c   :  { %579 = vst [vmem:[#allocation8 + $0x30] sm:$0xff] %v540_v53  ;;  %v586_v55 = vadd.f32 %v585_v40, %v540_v53  ;;  %v600_v56 = vmul.f32 %v540_v53, %v540_v53  ;;  %v543_v57 = vadd.f32 %v777_v54, %v737_v51 }
 0x13e   :  { %v607_v58 = vadd.f32 %v606_v47, %v600_v56  ;;  %580 = vst [vmem:[#allocation8 + $0x38] sm:$0xff] %v543_v57  ;;  %v587_v59 = vadd.f32 %v586_v55, %v543_v57  ;;  %v601_v60 = vmul.f32 %v543_v57, %v543_v57 }
 0x13f   :  { %899 = shalt.err (!%p896_p6)
}
 0x140   :  { %s900_s16 = scalar_lea.hbm %s1020_s2, 1024 }
 0x141   :  { %p901_p7 = scmp.ne.s32.totalorder %s1020_s2, %s900_s16  ;;  %p904_p8 = scmp.lt.u32.totalorder %s900_s16, %s1020_s2 }
 0x143   :  { %p906_p9 = pnand %p904_p8, %p901_p7 }
 0x145   :  { %909 = shalt.err (!%p906_p9)
}
 0x146   :  { %s947_s21 = smov 128   ;;  %s948_s22 = smov 8   ;;  %v588_v61 = vrot.slane %v587_v59, 4  ;;  %v608_v62 = vadd.f32 %v607_v58, %v601_v60  ;;  %vm615_vm0 = vcmask 1040384  }
 0x147   :  { %629 = dma.vmem_to_hbm [thread:$0]  %s624_s12, 1024, %s1020_s2, [#allocation5], %s947_s21, %s947_s21, %s948_s22  }
 0x148   :  { %v589_v63 = vadd.f32 %v588_v61, %v587_v59  ;;  %v609_v0 = vrot.slane %v608_v62, 4  ;;  %s949_s25 = smov [#allocation9]  }
 0x149   :  { %s636_s26 = sshll.u32 %s949_s25, 4  ;;  %s637_s26 = int_to_ptr.vmem [resolvable:$true] %s636_s26 }
 0x14a   :  { %v590_v1 = vrot.slane %v589_v63, 2  ;;  %v610_v2 = vadd.f32 %v609_v0, %v608_v62  ;;  %s910_s2 = scalar_lea.vmem %s637_s26, 32  ;;  %p915_p11 = scmp.lt.s32.totalorder %s637_s26, %s637_s26 }
 0x14b   :  { %p911_p10 = scmp.ne.s32.totalorder %s637_s26, %s910_s2  ;;  %p916_p12 = scmp.lt.s32.totalorder %s910_s2, %s910_s2 }
 0x14c   :  { %v591_v3 = vadd.f32 %v590_v1, %v589_v63  ;;  %v611_v4 = vrot.slane %v610_v2, 2 }
 0x14d   :  { %p917_p13 = por %p916_p12, %p915_p11 }
 0x14e   :  { %v592_v5 = vrot.slane %v591_v3, 1  ;;  %v612_v6 = vadd.f32 %v611_v4, %v610_v2 }
 0x14f   :  { %p918_p0 = pnand %p917_p13, %p911_p10 }
 0x150   :  { %v613_v7 = vrot.slane %v612_v6, 1  ;;  %v593_v8 = vadd.f32 %v592_v5, %v591_v3 }
 0x152   :  { %v614_v9 = vadd.f32 %v613_v7, %v612_v6 }
 0x154   :  { %v616_v10 = vsel %vm615_vm0, %v593_v8, %v614_v9 }
 0x155   :  { %617 = vst [vmem:[#allocation9] sm:$0x3] %v616_v10 }
 0x156   :  { %921 = shalt.err (!%p918_p0)
}
 0x157   :  { %s922_s29 = scalar_lea.hbm %s1021_s3, 32 }
 0x158   :  { %p923_p1 = scmp.ne.s32.totalorder %s1021_s3, %s922_s29  ;;  %p926_p2 = scmp.lt.u32.totalorder %s922_s29, %s1021_s3 }
 0x15a   :  { %p928_p3 = pnand %p926_p2, %p923_p1 }
 0x15c   :  { %931 = shalt.err (!%p928_p3)
}
 0x15d   :  { %639 = dma.vmem_to_hbm [thread:$0]  %s637_s26, 32, %s1021_s3, [#allocation10]  }
 0x15e   :  { %936 = dma.done.wait [#allocation5], 1024  }
 0x15f   :  { %937 = vsyncadd [#allocation5], 4294966272 }
 0x160   :  { %938 = dma.done.wait [#allocation10], 32  }
 0x161   :  { %939 = vsyncadd [#allocation10], 4294967264 }
 0x162   :  { %646 = vsyncpa [#allocation4], 1 }
 0x163   :  { %647 = vsyncpa [#allocation7], 1 }
 0x164   :  { %648 = vsyncpa [#allocation5], 1 }
 0x165   :  { %649 = vsyncpa [#allocation10], 1 }

</bundles_post_ra>
